<compile_context>
chip_gen: v7x
topology: tpu7x:2x2x1
jax: 0.10.0
libtpu: 0.0.40
codegen_flags: <defaults>
</compile_context>

<pallas_src>
import functools
import math

import jax
import jax.numpy as jnp
from jax.experimental import pallas as pl
from jax.experimental.pallas import tpu as pltpu


def _sage_gcn_kernel(src_ref, neigh_ref, w_all_ref, out_ref, *, input_dim):
    # w_all_ref = [ W (D,H) ; W_big (K*D,H) ] stacked on the contraction axis;
    # static slices on 8/16-row boundaries -> no tile-crossing copies.
    w_self = w_all_ref[:input_dim, :]                      # (D, H)
    w_neigh = w_all_ref[input_dim:, :]                     # (K*D, H)

    # Two independent MXU matmuls with f32 accumulation, then ReLU on the VPU.
    acc = jnp.dot(neigh_ref[...], w_neigh,
                  preferred_element_type=jnp.float32)      # (tm, H)
    acc += jnp.dot(src_ref[...], w_self,
                   preferred_element_type=jnp.float32)     # (tm, H)
    out_ref[...] = jnp.maximum(acc, 0.0).astype(out_ref.dtype)


def sage_gcn_forward(src, neigh, w_agg, w, *, tm=1024,
                     compute_dtype=jnp.bfloat16, out_dtype=jnp.float32):
    """SageGCN forward (mean neighbor aggregation, 'sum' combine, ReLU)."""
    N, D = src.shape
    _, K, Dn = neigh.shape
    assert Dn == D, "neighbor feature dim must match src feature dim"
    assert w_agg.shape[0] == D
    # 'sum' combine adds src (N, D) to the aggregated projection (N, hidden):
    # the module implicitly requires hidden_dim == input_dim.  Fail loudly.
    assert w_agg.shape[1] == D, "aggr_method='sum' requires hidden_dim == input_dim"
    assert w.shape[0] == D
    H = w.shape[1]

    # ---- weight folding (tiny f32 matmuls, done once outside the kernel) ----
    # mean(neigh,1) @ W_agg @ W  ==  neigh.reshape(N,K*D) @ (tile(W_agg@W,(K,1))/K)
    w2 = jnp.dot(w_agg.astype(jnp.float32), w.astype(jnp.float32),
                 precision=jax.lax.Precision.HIGHEST)          # (D, H)
    w_big = jnp.tile(w2, (K, 1)) / K                           # (K*D, H)
    w_all = jnp.concatenate([w.astype(jnp.float32), w_big], axis=0)  # (D+K*D, H)
    w_all = w_all.astype(compute_dtype)

    # ---- lane-dense, low-precision activations ----
    src_c = src.astype(compute_dtype)                          # (N, D)
    neigh2d = neigh.reshape(N, K * D).astype(compute_dtype)    # (N, K*D)

    # ---- pad node axis to a tile multiple (zero rows -> relu(0)=0, sliced off) ----
    n_tiles = pl.cdiv(N, tm)
    n_pad = n_tiles * tm
    if n_pad != N:
        src_c = jnp.pad(src_c, ((0, n_pad - N), (0, 0)))
        neigh2d = jnp.pad(neigh2d, ((0, n_pad - N), (0, 0)))

    kernel = functools.partial(_sage_gcn_kernel, input_dim=D)

    in_bytes = n_pad * (D + K * D) * jnp.dtype(compute_dtype).itemsize
    w_bytes = (D + K * D) * H * jnp.dtype(compute_dtype).itemsize
    out_bytes = n_pad * H * jnp.dtype(out_dtype).itemsize

    out = pl.pallas_call(
        kernel,
        out_shape=jax.ShapeDtypeStruct((n_pad, H), out_dtype),
        grid_spec=pltpu.PrefetchScalarGridSpec(
            num_scalar_prefetch=0,
            grid=(n_tiles,),
            in_specs=[
                pl.BlockSpec((tm, D), lambda i: (i, 0)),         # src node features
                pl.BlockSpec((tm, K * D), lambda i: (i, 0)),     # flattened neighbors
                pl.BlockSpec((D + K * D, H), lambda i: (0, 0)),  # fused resident weights
            ],
            out_specs=pl.BlockSpec((tm, H), lambda i: (i, 0)),
        ),
        compiler_params=pltpu.CompilerParams(
            dimension_semantics=("parallel",)),                  # shard node tiles across TCs
        cost_estimate=pl.CostEstimate(
            flops=2 * n_pad * (D + K * D) * H,
            transcendentals=0,
            bytes_accessed=in_bytes + w_bytes + out_bytes),
    )(src_c, neigh2d, w_all)

    return out[:N]


def kaiming_uniform(key, shape):
    # torch.nn.init.kaiming_uniform_ defaults (a=0, fan_in mode, leaky_relu):
    # for a 2D (in, out) tensor PyTorch's fan_in = shape[1].
    fan_in = shape[1]
    bound = math.sqrt(6.0 / fan_in)
    return jax.random.uniform(key, shape, jnp.float32, -bound, bound)


def reference_original_f32(src, neigh, w_agg, w):
    """Pure-f32 reference mirroring the PyTorch module's op order."""
    aggr = jnp.mean(neigh, axis=1)
    neigh_hidden = jnp.dot(aggr, w_agg, precision=jax.lax.Precision.HIGHEST)
    combined = src + neigh_hidden
    out = jnp.dot(combined, w, precision=jax.lax.Precision.HIGHEST)
    return jnp.maximum(out, 0.0)


def reference_folded(src, neigh, w_agg, w, compute_dtype=jnp.bfloat16):
    """Reference using exactly the kernel's folded weights / bf16 operands."""
    N, D = src.shape
    K = neigh.shape[1]
    w2 = jnp.dot(w_agg, w, precision=jax.lax.Precision.HIGHEST)
    w_big = jnp.tile(w2, (K, 1)) / K
    w_all = jnp.concatenate([w, w_big], axis=0)
    w_all = w_all.astype(compute_dtype).astype(jnp.float32)
    x = jnp.concatenate([src, neigh.reshape(N, K * D)], axis=1)
    x = x.astype(compute_dtype).astype(jnp.float32)
    out = jnp.dot(x, w_all, precision=jax.lax.Precision.HIGHEST)
    return jnp.maximum(out, 0.0)


if __name__ == "__main__":
    # Small demo consistent with the module: 500 source nodes, 8 sampled
    # neighbors each, input_dim == hidden_dim == 32 (required by 'sum' combine).
    # tm=128 -> pads to 512 rows, grid of 4 node tiles so the HBM pipeline
    # actually overlaps (default tm=1024 is for real graph sizes).
    N, K, D, H = 500, 8, 32, 32

    key = jax.random.PRNGKey(0)
    k_src, k_neigh, k_wagg, k_w = jax.random.split(key, 4)

    src = jax.random.normal(k_src, (N, D), jnp.float32)
    neigh = jax.random.normal(k_neigh, (N, K, D), jnp.float32)
    w_agg = kaiming_uniform(k_wagg, (D, H))   # NeighborAggregator.weight
    w = kaiming_uniform(k_w, (D, H))          # SageGCN.weight

    out = sage_gcn_forward(src, neigh, w_agg, w, tm=128)
    jax.block_until_ready(out)
    assert out.shape == (N, H)

    # Tight check: same bf16-rounded operands / folded weights as the kernel.
    ref_tight = reference_folded(src, neigh, w_agg, w)
    assert jnp.allclose(out, ref_tight, atol=1e-3, rtol=1e-3), (
        "kernel mismatch vs folded bf16 reference: "
        f"max |diff| = {float(jnp.max(jnp.abs(out - ref_tight)))}")

    # Semantics check: original f32 module math (bf16 inputs -> loose tolerance).
    ref_f32 = reference_original_f32(src, neigh, w_agg, w)
    assert jnp.allclose(out, ref_f32, atol=5e-2, rtol=5e-2), (
        "kernel drifted from module semantics: "
        f"max |diff| = {float(jnp.max(jnp.abs(out - ref_f32)))}")

    print("KERNEL_OK")
</pallas_src>

<mosaic_0001>
module attributes {stable_mosaic.version = 11 : i64} {
  func.func @_sage_gcn_kernel(%arg0: i32, %arg1: memref<128x32xbf16, #tpu.memory_space<vmem>>, %arg2: memref<128x256xbf16, #tpu.memory_space<vmem>>, %arg3: memref<288x32xbf16, #tpu.memory_space<vmem>>, %arg4: memref<128x32xf32, #tpu.memory_space<vmem>>) attributes {dimension_semantics = [#tpu.dimension_semantics<parallel>], iteration_bounds = array<i64: 4>, scalar_prefetch = 0 : i64, scratch_operands = 0 : i64, tpu.core_type = #tpu.core_type<tc>, window_params = [{transform_indices = @transform_0, window_bounds = array<i64: 128, 32>}, {transform_indices = @transform_1, window_bounds = array<i64: 128, 256>}, {pipeline_mode = #tpu.pipeline_mode<synchronous>, transform_indices = @transform_2, window_bounds = array<i64: 288, 32>}, {transform_indices = @transform_3, window_bounds = array<i64: 128, 32>}]} {
    %c0 = arith.constant 0 : index
    %c0_0 = arith.constant 0 : index
    %0 = vector.load %arg3[%c0, %c0_0] : memref<288x32xbf16, #tpu.memory_space<vmem>>, vector<32x32xbf16>
    %c32 = arith.constant 32 : index
    %c0_1 = arith.constant 0 : index
    %1 = vector.load %arg3[%c32, %c0_1] : memref<288x32xbf16, #tpu.memory_space<vmem>>, vector<256x32xbf16>
    %c0_2 = arith.constant 0 : index
    %c0_3 = arith.constant 0 : index
    %2 = vector.load %arg2[%c0_2, %c0_3] : memref<128x256xbf16, #tpu.memory_space<vmem>>, vector<128x256xbf16>
    %cst = arith.constant dense<0.000000e+00> : vector<128x32xf32>
    %3 = tpu.matmul %2, %1, %cst {dimension_numbers = #tpu.dot_dimension_numbers<[1], [0], [0], [1], [0, 0, 1, 1], [], []>} : vector<128x256xbf16>, vector<256x32xbf16>, vector<128x32xf32> -> vector<128x32xf32>
    %c0_4 = arith.constant 0 : index
    %c0_5 = arith.constant 0 : index
    %4 = vector.load %arg1[%c0_4, %c0_5] : memref<128x32xbf16, #tpu.memory_space<vmem>>, vector<128x32xbf16>
    %cst_6 = arith.constant dense<0.000000e+00> : vector<128x32xf32>
    %5 = tpu.matmul %4, %0, %cst_6 {dimension_numbers = #tpu.dot_dimension_numbers<[1], [0], [0], [1], [0, 0, 1, 1], [], []>} : vector<128x32xbf16>, vector<32x32xbf16>, vector<128x32xf32> -> vector<128x32xf32>
    %6 = arith.addf %3, %5 : vector<128x32xf32>
    %cst_7 = arith.constant 0.000000e+00 : f32
    %7 = vector.broadcast %cst_7 : f32 to vector<128x32xf32>
    %8 = arith.maximumf %6, %7 : vector<128x32xf32>
    %c0_8 = arith.constant 0 : index
    %c0_9 = arith.constant 0 : index
    %9 = vector.load %arg4[%c0_8, %c0_9] : memref<128x32xf32, #tpu.memory_space<vmem>>, vector<128x32xf32>
    tpu.vector_store %arg4[%c0_8, %c0_9], %8 {strides = array<i32>} : memref<128x32xf32, #tpu.memory_space<vmem>>, vector<128x32xf32>,
    return
  }
  func.func @transform_0(%arg0: i32) -> (i32, i32) {
    %c0_i32 = arith.constant 0 : i32
    %c0_i32_0 = arith.constant 0 : i32
    return %arg0, %c0_i32 : i32, i32
  }
  func.func @transform_1(%arg0: i32) -> (i32, i32) {
    %c0_i32 = arith.constant 0 : i32
    %c0_i32_0 = arith.constant 0 : i32
    return %arg0, %c0_i32 : i32, i32
  }
  func.func @transform_2(%arg0: i32) -> (i32, i32) {
    %c0_i32 = arith.constant 0 : i32
    %c0_i32_0 = arith.constant 0 : i32
    %c0_i32_1 = arith.constant 0 : i32
    return %c0_i32, %c0_i32_0 : i32, i32
  }
  func.func @transform_3(%arg0: i32) -> (i32, i32) {
    %c0_i32 = arith.constant 0 : i32
    %c0_i32_0 = arith.constant 0 : i32
    return %arg0, %c0_i32 : i32, i32
  }
}

</mosaic_0001>

<bundles_post_ra>
// kernel: tpu_custom_call.1
= control target key start
LH: loop header
LB: loop body
LE: loop exit
PB: predicated region body
PF: predicated region fallthrough
CT: control target
= control target key end

     0   :  { %s1076_s12 = smov 0   ;;  %s1249_s0 = inlined_call_operand.vmem [shape: bf16[512,32], index: 0, kind: input, shape index: {}]   ;;  %s1250_s1 = inlined_call_operand.vmem [shape: bf16[512,256], index: 1, kind: input, shape index: {}]   ;;  %s1251_s2 = inlined_call_operand.vmem [shape: bf16[288,32], index: 2, kind: input, shape index: {}]   ;;  %s1252_s3 = inlined_call_operand.vmem [shape: f32[512,32], index: 3, kind: output, shape index: {}]  }
   0x1 LB: > { %s815_s13 = sadd.s32 4294967295, %s1054_s12   ;;  %p819_p0 = scmp.ge.s32.totalorder %s1054_s12, 1  ;;  %s1054_s12 = sphi %s1076_s12, %s13_s12  }
   0x2   : > { %p150_p1 = scmp.lt.s32.totalorder %s1054_s12, 5 }
   0x4   : > { %p151_p2 = pnand %p819_p0, %p150_p1 }
   0x5   : > { %v998_v0 = vld [vmem:[%s1251_s2] sm:$0xff] (!%p151_p2)   ;;  %s820_s16 = sshll.u32 (!%p151_p2), %s815_s13, 4  ;;  %v999_v1 = vld [vmem:[%s1251_s2 + $0x50] sm:$0xff] (!%p151_p2)   ;;  %v1001_v3 = vld [vmem:[%s1251_s2 + $0x8] sm:$0xff] (!%p151_p2)   ;;  %vm320_vm0 = vcmask (!%p151_p2), 261120  }
   0x6   : > { %154 = sbr.rel (%p151_p2) target bundleno = 293 (0x125), region = 32  ;;  %p181_p3 = scmp.lt.s32.totalorder (!%p151_p2), %s820_s16, 63  ;;  %954 = vmatprep.subr.bf16.mxu0 (!%p151_p2), %v998_v0  ;;  %v1000_v2 = vld [vmem:[%s1251_s2 + $0x10] sm:$0xff] (!%p151_p2)   ;;  %974 = vmatprep.subr.bf16.mxu1 (!%p151_p2), %v999_v1  ;;  %v1002_v4 = vld [vmem:[%s1251_s2 + $0x58] sm:$0xff] (!%p151_p2)   ;;  %v1006_v6 = vld [vmem:[%s1251_s2 + $0x60] sm:$0xff] (!%p151_p2)  }
   0x7   : > { %955 = vmatpush3.bf16.msra.mxu0 (!%p151_p2), %v998_v0  ;;  %982 = vmatpush3.bf16.msra.mxu1 (!%p151_p2), %v1000_v2  ;;  %v1003_v5 = vld [vmem:[%s1251_s2 + $0x18] sm:$0xff] (!%p151_p2)   ;;  %v1007_v9 = vld [vmem:[%s1251_s2 + $0x20] sm:$0xff] (!%p151_p2)   ;;  %v1008_v10 = vld [vmem:[%s1251_s2 + $0x68] sm:$0xff] (!%p151_p2)  }
   0x8   : > { %956 = vmatprep.subr.bf16.mxu0 (!%p151_p2), %v1001_v3  ;;  %975 = vmatprep.subr.bf16.mxu1 (!%p151_p2), %v1002_v4  ;;  %v1009_v11 = vld [vmem:[%s1251_s2 + $0x28] sm:$0xff] (!%p151_p2)   ;;  %v1012_v14 = vld [vmem:[%s1251_s2 + $0x70] sm:$0xff] (!%p151_p2)   ;;  %v1014_v16 = vld [vmem:[%s1251_s2 + $0x78] sm:$0xff] (!%p151_p2)  }
   0x9   : > { %v1013_v15 = vld [vmem:[%s1251_s2 + $0x30] sm:$0xff] (!%p151_p2)   ;;  %v1015_v18 = vld [vmem:[%s1251_s2 + $0x38] sm:$0xff] (!%p151_p2)   ;;  %v1018_v19 = vld [vmem:[%s1251_s2 + $0x80] sm:$0xff] (!%p151_p2)  }
   0xa   : > { %v1019_v21 = vld [vmem:[%s1251_s2 + $0x40] sm:$0xff] (!%p151_p2)   ;;  %v1020_v23 = vld [vmem:[%s1251_s2 + $0x88] sm:$0xff] (!%p151_p2)  }
   0xb   : > { %957 = vmatpush3.bf16.msra.mxu0 (!%p151_p2), %v1001_v3  ;;  %983 = vmatpush3.bf16.msra.mxu1 (!%p151_p2), %v1003_v5  ;;  %v1021_v25 = vld [vmem:[%s1251_s2 + $0x48] sm:$0xff] (!%p151_p2)  }
   0xc   : > { %890 = vmatprep.subr.bf16.mxu0 (!%p151_p2), %v999_v1  ;;  %976 = vmatprep.subr.bf16.mxu1 (!%p151_p2), %v1006_v6 }
   0xd   : > { %s1254_s16 = smov (!%p181_p3, %s820_s16), 63 }
   0xe   : > { %s821_s27 = sshll.u32 %s1254_s16, 2  ;;  %s879_s22 = sshll.u32 %s1254_s16, 3 }
   0xf   : > { %s1108_s30 = scalar_lea.vmem %s1249_s0, %s821_s27  ;;  %984 = vmatpush3.bf16.msra.mxu1 %v1007_v9  ;;  %s1157_s29 = scalar_lea.vmem %s1250_s1, %s879_s22 }
  0x10   : > { %v1004_v7 = vld [vmem:[%s1108_s30] sm:$0xff]   ;;  %v1005_v8 = vld [vmem:[%s1108_s30 + $0x8] sm:$0xff]   ;;  %v1010_v12 = vld [vmem:[%s1108_s30 + $0x10] sm:$0xff]   ;;  %977 = vmatprep.subr.bf16.mxu1 %v1008_v10  ;;  %s1205_s9 = scalar_lea.vmem %s1252_s3, %s879_s22 }
  0x11   : > { %958 = vmatprep.mubr.msk.bf16.mxu0 %vm320_vm0, %v1004_v7  ;;  %v1011_v13 = vld [vmem:[%s1108_s30 + $0x18] sm:$0xff]   ;;  %v1016_v17 = vld [vmem:[%s1108_s30 + $0x20] sm:$0xff]   ;;  %v1017_v20 = vld [vmem:[%s1108_s30 + $0x28] sm:$0xff]  }
  0x12   : > { %959 = vmatmul.mubr.msk.bf16.vlgmr.msra.gmra.mrb[0].mxu0 %vm320_vm0, %v1005_v8  ;;  %v1022_v22 = vld [vmem:[%s1108_s30 + $0x30] sm:$0xff]   ;;  %v1026_v26 = vld [vmem:[%s1108_s30 + $0x38] sm:$0xff]   ;;  %v1029_v28 = vld [vmem:[%s1157_s29 + $0x4] ss:$8 sps:$4 sm:$0xff]  }
  0x13   : > { %891 = vmatpush3.bf16.msra.mxu0 %v1000_v2  ;;  %962 = vmatprep.mubr.msk.bf16.mxu0 %vm320_vm0, %v1010_v12  ;;  %v1025_v24 = vld [vmem:[%s1157_s29 + $0x34] ss:$8 sps:$4 sm:$0xff]   ;;  %v1023_v27 = vld [vmem:[%s1157_s29 + $0x30] ss:$8 sps:$4 sm:$0xff]   ;;  %v1030_v29 = vld [vmem:[%s1157_s29 + $0x44] ss:$8 sps:$4 sm:$0xff]  }
  0x14   : > { %892 = vmatprep.subr.bf16.mxu0 %v1002_v4  ;;  %985 = vmatpush3.bf16.msra.mxu1 %v1009_v11  ;;  %v1027_v30 = vld [vmem:[%s1157_s29] ss:$8 sps:$4 sm:$0xff]   ;;  %v1033_v32 = vld [vmem:[%s1157_s29 + $0x14] ss:$8 sps:$4 sm:$0xff]   ;;  %v1037_v34 = vld [vmem:[%s1157_s29 + $0x10] ss:$8 sps:$4 sm:$0xff]  }
  0x15   : > { %978 = vmatprep.subr.bf16.mxu1 %v1012_v14  ;;  %674 = vmatprep.mubr.bf16.mxu1 %v1025_v24  ;;  %v1032_v31 = vld [vmem:[%s1157_s29 + $0x40] ss:$8 sps:$4 sm:$0xff]   ;;  %v1035_v33 = vld [vmem:[%s1157_s29 + $0x54] ss:$8 sps:$4 sm:$0xff]   ;;  %v1038_v35 = vld [vmem:[%s1157_s29 + $0x50] ss:$8 sps:$4 sm:$0xff]  }
  0x16   : > { %v1039_v36 = vld [vmem:[%s1157_s29 + $0x24] ss:$8 sps:$4 sm:$0xff]   ;;  %v1043_v38 = vld [vmem:[%s1157_s29 + $0x20] ss:$8 sps:$4 sm:$0xff]   ;;  %v1045_v40 = vld [vmem:[%s1157_s29 + $0x74] ss:$8 sps:$4 sm:$0xff]  }
  0x17   : > { %893 = vmatpush3.bf16.msra.mxu0 %v1003_v5  ;;  %v1041_v37 = vld [vmem:[%s1157_s29 + $0x64] ss:$8 sps:$4 sm:$0xff]   ;;  %v1044_v39 = vld [vmem:[%s1157_s29 + $0x60] ss:$8 sps:$4 sm:$0xff]   ;;  %v1047_v41 = vld [vmem:[%s1157_s29 + $0x70] ss:$8 sps:$4 sm:$0xff]  }
  0x18   : > { %894 = vmatprep.subr.bf16.mxu0 %v1006_v6  ;;  %986 = vmatpush3.bf16.msra.mxu1 %v1013_v15 }
  0x19   : > { %979 = vmatprep.subr.bf16.mxu1 %v1014_v16 }
  0x1a   : > { %963 = vmatmul.mubr.msk.bf16.gmra.mrb[4].mxu0 %vm320_vm0, %v1011_v13 }
  0x1b   : > { %895 = vmatpush3.bf16.msra.mxu0 %v1007_v9  ;;  %966 = vmatprep.mubr.msk.bf16.mxu0 %vm320_vm0, %v1016_v17 }
  0x1c   : > { %896 = vmatprep.subr.bf16.mxu0 %v1008_v10  ;;  %987 = vmatpush3.bf16.msra.mxu1 %v1015_v18 }
  0x1d   : > { %980 = vmatprep.subr.bf16.mxu1 %v1018_v19 }
  0x1f   : > { %897 = vmatpush3.bf16.msra.mxu0 %v1009_v11 }
  0x20   : > { %898 = vmatprep.subr.bf16.mxu0 %v1012_v14  ;;  %988 = vmatpush3.bf16.msra.mxu1 %v1019_v21 }
  0x21   : > { %981 = vmatprep.subr.bf16.mxu1 %v1020_v23 }
  0x22   : > { %967 = vmatmul.mubr.msk.bf16.gmra.mrb[8].mxu0 %vm320_vm0, %v1017_v20 }
  0x23   : > { %899 = vmatpush3.bf16.msra.mxu0 %v1013_v15  ;;  %970 = vmatprep.mubr.msk.bf16.mxu0 %vm320_vm0, %v1022_v22 }
  0x24   : > { %900 = vmatprep.subr.bf16.mxu0 %v1014_v16  ;;  %989 = vmatpush3.bf16.msra.mxu1 %v1021_v25 }
  0x27   : > { %901 = vmatpush3.bf16.msra.mxu0 %v1015_v18  ;;  %675 = vmatmul.mubr.bf16.vlgmr.msra.gmra.mrb[0].mxu1 %v1023_v27 }
  0x28   : > { %902 = vmatprep.subr.bf16.mxu0 %v1018_v19  ;;  %682 = vmatprep.mubr.bf16.mxu1 %v1030_v29 }
  0x2a   : > { %971 = vmatmul.mubr.msk.bf16.gmra.mrb[12].mxu0 %vm320_vm0, %v1026_v26 }
  0x2b   : > { %903 = vmatpush3.bf16.msra.mxu0 %v1019_v21  ;;  %650 = vmatprep.mubr.bf16.mxu0 %v1029_v28 }
  0x2c   : > { %904 = vmatprep.subr.bf16.mxu0 %v1020_v23 }
  0x2f   : > { %905 = vmatpush3.bf16.msra.mxu0 %v1021_v25  ;;  %683 = vmatmul.mubr.bf16.gmra.mrb[4].mxu1 %v1032_v31 }
  0x30   : > { %690 = vmatprep.mubr.bf16.mxu1 %v1035_v33 }
  0x32   : > { %651 = vmatmul.mubr.bf16.vlgmr.msra.gmra.mrb[16].mxu0 %v1027_v30 }
  0x33   : > { %658 = vmatprep.mubr.bf16.mxu0 %v1033_v32 }
  0x37   : > { %691 = vmatmul.mubr.bf16.gmra.mrb[8].mxu1 %v1038_v35 }
  0x38   : > { %698 = vmatprep.mubr.bf16.mxu1 %v1041_v37 }
  0x3a   : > { %659 = vmatmul.mubr.bf16.gmra.mrb[20].mxu0 %v1037_v34 }
  0x3b   : > { %666 = vmatprep.mubr.bf16.mxu0 %v1039_v36 }
  0x3f   : > { %699 = vmatmul.mubr.bf16.gmra.mrb[12].mxu1 %v1044_v39 }
  0x40   : > { %706 = vmatprep.mubr.bf16.mxu1 %v1045_v40 }
  0x42   : > { %667 = vmatmul.mubr.bf16.gmra.mrb[24].mxu0 %v1043_v38 }
  0x47   : > { %707 = vmatmul.mubr.bf16.gmra.mrb[16].mxu1 %v1047_v41 }
  0xe5   : > { %v960_v42 = vpop.f32.mrb[0].mxu0 }
  0xe6   : > { %v379_v43 = vpop.f32.mrb[1].mxu0 }
  0xe7   : > { %v1186_v44 = vpop.f32.mrb[2].mxu0 }
  0xe8   : > { %v382_v45 = vpop.f32.mrb[3].mxu0 }
  0xed   : > { %v964_v46 = vpop.f32.mrb[4].mxu0 }
  0xee   : > { %v1188_v47 = vpop.f32.mrb[5].mxu0 }
  0xef   : > { %v965_v48 = vpop.f32.mrb[6].mxu0 }
  0xf0   : > { %v1190_v49 = vpop.f32.mrb[7].mxu0 }
  0xf5   : > { %v968_v50 = vpop.f32.mrb[8].mxu0 }
  0xf6   : > { %v411_v51 = vpop.f32.mrb[9].mxu0 }
  0xf7   : > { %v969_v52 = vpop.f32.mrb[10].mxu0 }
  0xf8   : > { %v414_v53 = vpop.f32.mrb[11].mxu0 }
  0xfa   : > { %v924_v55 = vpop.f32.mrb[0].mxu1 }
  0xfb   : > { %v925_v57 = vpop.f32.mrb[1].mxu1 }
  0xfc   : > { %v926_v59 = vadd.f32 %v925_v57, %v924_v55  ;;  %v927_v60 = vpop.f32.mrb[2].mxu1 }
  0xfd   : > { %v1192_v54 = vpop.f32.mrb[12].mxu0  ;;  %v928_v62 = vpop.f32.mrb[3].mxu1 }
  0xfe   : > { %v1194_v56 = vpop.f32.mrb[13].mxu0  ;;  %v677_v63 = vadd.f32 %v964_v46, %v926_v59  ;;  %v929_v0 = vadd.f32 %v928_v62, %v927_v60 }
  0xff   : > { %v1196_v58 = vpop.f32.mrb[14].mxu0 }
 0x100   : > { %v1198_v61 = vpop.f32.mrb[15].mxu0  ;;  %v721_v1 = vmax.f32 %v677_v63, 0.0  ;;  %v680_v2 = vadd.f32 %v965_v48, %v929_v0 }
 0x102   : > { %737 = vst.msk [vmem:[%s1205_s9 + $0x30] sm:$0xff] %vm320_vm0, %v721_v1  ;;  %v722_v4 = vmax.f32 %v680_v2, 0.0  ;;  %v930_v5 = vpop.f32.mrb[4].mxu1 }
 0x103   : > { %v931_v8 = vpop.f32.mrb[5].mxu1 }
 0x104   : > { %738 = vst.msk [vmem:[%s1205_s9 + $0x38] sm:$0xff] %vm320_vm0, %v722_v4  ;;  %v932_v10 = vadd.f32 %v931_v8, %v930_v5  ;;  %v933_v11 = vpop.f32.mrb[6].mxu1 }
 0x105   : > { %v906_v3 = vpop.f32.mrb[16].mxu0  ;;  %v934_v15 = vpop.f32.mrb[7].mxu1 }
 0x106   : > { %v907_v6 = vpop.f32.mrb[17].mxu0  ;;  %v685_v16 = vadd.f32 %v932_v10, %v411_v51  ;;  %v935_v17 = vadd.f32 %v934_v15, %v933_v11 }
 0x107   : > { %v908_v7 = vadd.f32 %v907_v6, %v906_v3  ;;  %v909_v9 = vpop.f32.mrb[18].mxu0 }
 0x108   : > { %v910_v12 = vpop.f32.mrb[19].mxu0  ;;  %v723_v20 = vmax.f32 %v685_v16, 0.0  ;;  %v688_v21 = vadd.f32 %v935_v17, %v414_v53 }
 0x109   : > { %v653_v13 = vadd.f32 %v908_v7, %v379_v43  ;;  %v911_v14 = vadd.f32 %v910_v12, %v909_v9 }
 0x10a   : > { %739 = vst.msk [vmem:[%s1205_s9 + $0x40] sm:$0xff] %vm320_vm0, %v723_v20  ;;  %v724_v24 = vmax.f32 %v688_v21, 0.0  ;;  %v936_v25 = vpop.f32.mrb[8].mxu1 }
 0x10b   : > { %v715_v18 = vmax.f32 %v653_v13, 0.0  ;;  %v656_v19 = vadd.f32 %v911_v14, %v382_v45  ;;  %v937_v28 = vpop.f32.mrb[9].mxu1 }
 0x10c   : > { %740 = vst.msk [vmem:[%s1205_s9 + $0x48] sm:$0xff] %vm320_vm0, %v724_v24  ;;  %v938_v30 = vadd.f32 %v937_v28, %v936_v25  ;;  %v939_v31 = vpop.f32.mrb[10].mxu1 }
 0x10d   : > { %731 = vst.msk [vmem:[%s1205_s9] sm:$0xff] %vm320_vm0, %v715_v18  ;;  %v716_v22 = vmax.f32 %v656_v19, 0.0  ;;  %v912_v23 = vpop.f32.mrb[20].mxu0  ;;  %v940_v35 = vpop.f32.mrb[11].mxu1 }
 0x10e   : > { %v913_v26 = vpop.f32.mrb[21].mxu0  ;;  %v693_v36 = vadd.f32 %v968_v50, %v938_v30  ;;  %v941_v37 = vadd.f32 %v940_v35, %v939_v31 }
 0x10f   : > { %732 = vst.msk [vmem:[%s1205_s9 + $0x8] sm:$0xff] %vm320_vm0, %v716_v22  ;;  %v914_v27 = vadd.f32 %v913_v26, %v912_v23  ;;  %v915_v29 = vpop.f32.mrb[22].mxu0 }
 0x110   : > { %v916_v32 = vpop.f32.mrb[23].mxu0  ;;  %v725_v40 = vmax.f32 %v693_v36, 0.0  ;;  %v696_v41 = vadd.f32 %v969_v52, %v941_v37 }
 0x111   : > { %v661_v33 = vadd.f32 %v960_v42, %v914_v27  ;;  %v917_v34 = vadd.f32 %v916_v32, %v915_v29 }
 0x112   : > { %741 = vst.msk [vmem:[%s1205_s9 + $0x50] sm:$0xff] %vm320_vm0, %v725_v40  ;;  %v726_v46 = vmax.f32 %v696_v41, 0.0  ;;  %v942_v48 = vpop.f32.mrb[12].mxu1 }
 0x113   : > { %v717_v38 = vmax.f32 %v661_v33, 0.0  ;;  %v664_v39 = vadd.f32 %v1186_v44, %v917_v34  ;;  %v943_v50 = vpop.f32.mrb[13].mxu1 }
 0x114   : > { %742 = vst.msk [vmem:[%s1205_s9 + $0x58] sm:$0xff] %vm320_vm0, %v726_v46  ;;  %v944_v44 = vadd.f32 %v943_v50, %v942_v48  ;;  %v945_v52 = vpop.f32.mrb[14].mxu1 }
 0x115   : > { %733 = vst.msk [vmem:[%s1205_s9 + $0x10] sm:$0xff] %vm320_vm0, %v717_v38  ;;  %v718_v43 = vmax.f32 %v664_v39, 0.0  ;;  %v918_v45 = vpop.f32.mrb[24].mxu0  ;;  %v946_v60 = vpop.f32.mrb[15].mxu1 }
 0x116   : > { %v919_v42 = vpop.f32.mrb[25].mxu0  ;;  %v701_v62 = vadd.f32 %v944_v44, %v1194_v56  ;;  %v947_v63 = vadd.f32 %v946_v60, %v945_v52 }
 0x117   : > { %734 = vst.msk [vmem:[%s1205_s9 + $0x18] sm:$0xff] %vm320_vm0, %v718_v43  ;;  %v920_v51 = vadd.f32 %v919_v42, %v918_v45  ;;  %v921_v53 = vpop.f32.mrb[26].mxu0 }
 0x118   : > { %v922_v55 = vpop.f32.mrb[27].mxu0  ;;  %v727_v2 = vmax.f32 %v701_v62, 0.0  ;;  %v704_v3 = vadd.f32 %v947_v63, %v1198_v61 }
 0x119   : > { %v669_v57 = vadd.f32 %v920_v51, %v1188_v47  ;;  %v923_v59 = vadd.f32 %v922_v55, %v921_v53 }
 0x11a   : > { %743 = vst.msk [vmem:[%s1205_s9 + $0x60] sm:$0xff] %vm320_vm0, %v727_v2  ;;  %v728_v47 = vmax.f32 %v704_v3, 0.0  ;;  %v948_v5 = vpop.f32.mrb[16].mxu1 }
 0x11b   : > { %v719_v0 = vmax.f32 %v669_v57, 0.0  ;;  %v672_v1 = vadd.f32 %v923_v59, %v1190_v49  ;;  %v949_v6 = vpop.f32.mrb[17].mxu1 }
 0x11c   : > { %744 = vst.msk [vmem:[%s1205_s9 + $0x68] sm:$0xff] %vm320_vm0, %v728_v47  ;;  %v950_v56 = vadd.f32 %v949_v6, %v948_v5  ;;  %v951_v7 = vpop.f32.mrb[18].mxu1 }
 0x11d   : > { %735 = vst.msk [vmem:[%s1205_s9 + $0x20] sm:$0xff] %vm320_vm0, %v719_v0  ;;  %v720_v4 = vmax.f32 %v672_v1, 0.0  ;;  %v952_v49 = vpop.f32.mrb[19].mxu1 }
 0x11e   : > { %v709_v8 = vadd.f32 %v1192_v54, %v950_v56  ;;  %v953_v61 = vadd.f32 %v952_v49, %v951_v7 }
 0x11f   : > { %736 = vst.msk [vmem:[%s1205_s9 + $0x28] sm:$0xff] %vm320_vm0, %v720_v4 }
 0x120   : > { %v729_v9 = vmax.f32 %v709_v8, 0.0  ;;  %v712_v10 = vadd.f32 %v1196_v58, %v953_v61 }
 0x122   : > { %745 = vst.msk [vmem:[%s1205_s9 + $0x70] sm:$0xff] %vm320_vm0, %v729_v9  ;;  %v730_v11 = vmax.f32 %v712_v10, 0.0 }
 0x124   : > { %746 = vst.msk [vmem:[%s1205_s9 + $0x78] sm:$0xff] %vm320_vm0, %v730_v11 }
 0x125 PF: > { %s13_s12 = sadd.s32 1, %s1054_s12  }
 0x126   : > { %p10_p4 = scmp.ge.s32.totalorder %s13_s12, 6  }
 0x128   :  { %12 = sbr.rel (!%p10_p4) target bundleno = 1 (0x1), region = 65 }

</bundles_post_ra>
